<compile_context>
chip_gen: v7x
topology: tpu7x:2x2x1
jax: 0.10.0
libtpu: 0.0.40
codegen_flags: <defaults>
</compile_context>

<pallas_src>
import jax
import jax.numpy as jnp
from jax.experimental import pallas as pl
from jax.experimental.pallas import tpu as pltpu


# ----------------------------------------------------------------------------
# Kernels
# ----------------------------------------------------------------------------
def _double_linear_kernel(x_ref, hx_ref, w_ref, b_ref, o_ref, ho_ref,
                          acc_x, acc_h):
    """Two matmuls sharing one weight tile.  Grid = (M_tiles, N_tiles, K_tiles)."""
    k = pl.program_id(2)

    @pl.when(k == 0)
    def _():
        acc_x[...] = jnp.zeros_like(acc_x)
        acc_h[...] = jnp.zeros_like(acc_h)

    w = w_ref[...]                                   # (TK, TN), loaded once
    acc_x[...] += jnp.dot(x_ref[...], w, preferred_element_type=jnp.float32)
    acc_h[...] += jnp.dot(hx_ref[...], w, preferred_element_type=jnp.float32)

    @pl.when(k == pl.num_programs(2) - 1)
    def _():
        b = b_ref[...]                               # (1, TN) broadcast once
        o_ref[...] = (acc_x[...] + b).astype(o_ref.dtype)
        ho_ref[...] = (acc_h[...] + b).astype(ho_ref.dtype)


def _single_linear_kernel(x_ref, w_ref, b_ref, o_ref, acc):
    """Inference path: one matmul."""
    k = pl.program_id(2)

    @pl.when(k == 0)
    def _():
        acc[...] = jnp.zeros_like(acc)

    acc[...] += jnp.dot(x_ref[...], w_ref[...],
                        preferred_element_type=jnp.float32)

    @pl.when(k == pl.num_programs(2) - 1)
    def _():
        o_ref[...] = (acc[...] + b_ref[...]).astype(o_ref.dtype)


# ----------------------------------------------------------------------------
# Wrappers
# ----------------------------------------------------------------------------
def _round_up(x, m):
    return (x + m - 1) // m * m


def _pad2(a, rows, cols):
    r, c = a.shape
    if r == rows and c == cols:
        return a
    return jnp.pad(a, ((0, rows - r), (0, cols - c)))


def _tiling(M, K, N):
    """Pad to (8,128)-aligned shapes and pick MXU-friendly tiles."""
    Mp = _round_up(M, 8)
    Kp = _round_up(K, 128)
    Np = _round_up(N, 128)
    TM = min(256, Mp)
    TN = min(256, Np)
    TK = min(512, Kp)
    Mp = _round_up(Mp, TM)
    Np = _round_up(Np, TN)
    Kp = _round_up(Kp, TK)
    return Mp, Kp, Np, TM, TK, TN


def _double_linear(x, histx, w_t, b):
    """x, histx: (M, K); w_t: (K, N) pre-transposed; b: (N,) -> (h, histh)."""
    M, K = x.shape
    _, N = w_t.shape
    Mp, Kp, Np, TM, TK, TN = _tiling(M, K, N)

    xp = _pad2(x, Mp, Kp)
    hp = _pad2(histx, Mp, Kp)
    wp = _pad2(w_t, Kp, Np)
    bp = _pad2(b.reshape(1, N), 1, Np)

    grid = (Mp // TM, Np // TN, Kp // TK)

    h_p, hh_p = pl.pallas_call(
        _double_linear_kernel,
        out_shape=(jax.ShapeDtypeStruct((Mp, Np), x.dtype),
                   jax.ShapeDtypeStruct((Mp, Np), x.dtype)),
        grid_spec=pltpu.PrefetchScalarGridSpec(
            num_scalar_prefetch=0,
            grid=grid,
            in_specs=[
                pl.BlockSpec((TM, TK), lambda i, j, k: (i, k)),   # x
                pl.BlockSpec((TM, TK), lambda i, j, k: (i, k)),   # histx
                pl.BlockSpec((TK, TN), lambda i, j, k: (k, j)),   # W^T
                pl.BlockSpec((1, TN), lambda i, j, k: (0, j)),    # bias
            ],
            out_specs=[
                pl.BlockSpec((TM, TN), lambda i, j, k: (i, j)),
                pl.BlockSpec((TM, TN), lambda i, j, k: (i, j)),
            ],
            scratch_shapes=[pltpu.VMEM((TM, TN), jnp.float32),
                            pltpu.VMEM((TM, TN), jnp.float32)],
        ),
        compiler_params=pltpu.CompilerParams(
            dimension_semantics=("parallel", "parallel", "arbitrary")),
    )(xp, hp, wp, bp)

    return h_p[:M, :N], hh_p[:M, :N]


def _single_linear(x, w_t, b):
    M, K = x.shape
    _, N = w_t.shape
    Mp, Kp, Np, TM, TK, TN = _tiling(M, K, N)

    xp = _pad2(x, Mp, Kp)
    wp = _pad2(w_t, Kp, Np)
    bp = _pad2(b.reshape(1, N), 1, Np)

    grid = (Mp // TM, Np // TN, Kp // TK)

    h_p = pl.pallas_call(
        _single_linear_kernel,
        out_shape=jax.ShapeDtypeStruct((Mp, Np), x.dtype),
        grid_spec=pltpu.PrefetchScalarGridSpec(
            num_scalar_prefetch=0,
            grid=grid,
            in_specs=[
                pl.BlockSpec((TM, TK), lambda i, j, k: (i, k)),
                pl.BlockSpec((TK, TN), lambda i, j, k: (k, j)),
                pl.BlockSpec((1, TN), lambda i, j, k: (0, j)),
            ],
            out_specs=pl.BlockSpec((TM, TN), lambda i, j, k: (i, j)),
            scratch_shapes=[pltpu.VMEM((TM, TN), jnp.float32)],
        ),
        compiler_params=pltpu.CompilerParams(
            dimension_semantics=("parallel", "parallel", "arbitrary")),
    )(xp, wp, bp)

    return h_p[:M, :N]


def double_forward(inputs, w, b, training=True):
    """Pallas equivalent of DoubleForward.forward with nn_block = Linear(w, b).

    w: (H_OUT, H_IN) as in nn.Linear; transposed once here (amortized / free
    if weights are stored transposed upstream).
    """
    w_t = jnp.transpose(w)                     # (H_IN, H_OUT), one-time
    if not training:
        return _single_linear(inputs, w_t, b)
    x, histx = inputs
    return _double_linear(x, histx, w_t, b)


# ----------------------------------------------------------------------------
# Self-test
# ----------------------------------------------------------------------------
if __name__ == "__main__":
    B, H_IN, H_OUT = 8, 32, 32
    key = jax.random.PRNGKey(0)
    kx, kh, kw, kb = jax.random.split(key, 4)

    x = jax.random.normal(kx, (B, H_IN), dtype=jnp.float32)
    histx = jax.random.normal(kh, (B, H_IN), dtype=jnp.float32)
    # Deterministic nn.Linear-style params (uniform in +-1/sqrt(H_IN)).
    bound = 1.0 / (H_IN ** 0.5)
    w = jax.random.uniform(kw, (H_OUT, H_IN), jnp.float32, -bound, bound)
    b = jax.random.uniform(kb, (H_OUT,), jnp.float32, -bound, bound)

    # Training path: both forwards in a single pallas_call.
    h, histh = double_forward((x, histx), w, b, training=True)
    jax.block_until_ready((h, histh))

    ref_h = x @ w.T + b
    ref_histh = histx @ w.T + b
    assert jnp.allclose(h, ref_h, atol=1e-5, rtol=1e-5)
    assert jnp.allclose(histh, ref_histh, atol=1e-5, rtol=1e-5)

    # Inference path: single linear pass.
    h_eval = double_forward(x, w, b, training=False)
    jax.block_until_ready(h_eval)
    assert jnp.allclose(h_eval, ref_h, atol=1e-5, rtol=1e-5)

    print("KERNEL_OK")
</pallas_src>

<mosaic_0001>
module attributes {stable_mosaic.version = 11 : i64} {
  func.func @_double_linear_kernel(%arg0: i32, %arg1: i32, %arg2: i32, %arg3: memref<8x128xf32, #tpu.memory_space<vmem>>, %arg4: memref<8x128xf32, #tpu.memory_space<vmem>>, %arg5: memref<128x128xf32, #tpu.memory_space<vmem>>, %arg6: memref<1x128xf32, #tpu.memory_space<vmem>>, %arg7: memref<8x128xf32, #tpu.memory_space<vmem>>, %arg8: memref<8x128xf32, #tpu.memory_space<vmem>>, %arg9: memref<8x128xf32, #tpu.memory_space<vmem>>, %arg10: memref<8x128xf32, #tpu.memory_space<vmem>>) attributes {dimension_semantics = [#tpu.dimension_semantics<parallel>, #tpu.dimension_semantics<parallel>, #tpu.dimension_semantics<arbitrary>], iteration_bounds = array<i64: 1, 1, 1>, scalar_prefetch = 0 : i64, scratch_operands = 2 : i64, tpu.core_type = #tpu.core_type<tc>, window_params = [{transform_indices = @transform_0, window_bounds = array<i64: 8, 128>}, {transform_indices = @transform_1, window_bounds = array<i64: 8, 128>}, {transform_indices = @transform_2, window_bounds = array<i64: 128, 128>}, {transform_indices = @transform_3, window_bounds = array<i64: 1, 128>}, {transform_indices = @transform_4, window_bounds = array<i64: 8, 128>}, {transform_indices = @transform_5, window_bounds = array<i64: 8, 128>}]} {
    %c0_i32 = arith.constant 0 : i32
    %0 = arith.cmpi eq, %arg2, %c0_i32 : i32
    %1 = arith.extui %0 : i1 to i32
    %c0_i32_0 = arith.constant 0 : i32
    %2 = arith.cmpi ne, %1, %c0_i32_0 : i32
    scf.if %2 {
      %cst_17 = arith.constant 0.000000e+00 : f32
      %17 = vector.broadcast %cst_17 : f32 to vector<8x128xf32>
      %c0_18 = arith.constant 0 : index
      %c0_19 = arith.constant 0 : index
      %18 = vector.load %arg9[%c0_18, %c0_19] : memref<8x128xf32, #tpu.memory_space<vmem>>, vector<8x128xf32>
      tpu.vector_store %arg9[%c0_18, %c0_19], %17 {strides = array<i32>} : memref<8x128xf32, #tpu.memory_space<vmem>>, vector<8x128xf32>,
      %cst_20 = arith.constant 0.000000e+00 : f32
      %19 = vector.broadcast %cst_20 : f32 to vector<8x128xf32>
      %c0_21 = arith.constant 0 : index
      %c0_22 = arith.constant 0 : index
      %20 = vector.load %arg10[%c0_21, %c0_22] : memref<8x128xf32, #tpu.memory_space<vmem>>, vector<8x128xf32>
      tpu.vector_store %arg10[%c0_21, %c0_22], %19 {strides = array<i32>} : memref<8x128xf32, #tpu.memory_space<vmem>>, vector<8x128xf32>,
    } else {
    }
    %c0 = arith.constant 0 : index
    %c0_1 = arith.constant 0 : index
    %3 = vector.load %arg5[%c0, %c0_1] : memref<128x128xf32, #tpu.memory_space<vmem>>, vector<128x128xf32>
    %c0_2 = arith.constant 0 : index
    %c0_3 = arith.constant 0 : index
    %4 = vector.load %arg9[%c0_2, %c0_3] : memref<8x128xf32, #tpu.memory_space<vmem>>, vector<8x128xf32>
    %c0_4 = arith.constant 0 : index
    %c0_5 = arith.constant 0 : index
    %5 = vector.load %arg3[%c0_4, %c0_5] : memref<8x128xf32, #tpu.memory_space<vmem>>, vector<8x128xf32>
    %cst = arith.constant dense<0.000000e+00> : vector<8x128xf32>
    %6 = tpu.matmul %5, %3, %cst {dimension_numbers = #tpu.dot_dimension_numbers<[1], [0], [0], [1], [0, 0, 1, 1], [], []>} : vector<8x128xf32>, vector<128x128xf32>, vector<8x128xf32> -> vector<8x128xf32>
    %7 = arith.addf %4, %6 : vector<8x128xf32>
    %c0_6 = arith.constant 0 : index
    %c0_7 = arith.constant 0 : index
    %8 = vector.load %arg9[%c0_6, %c0_7] : memref<8x128xf32, #tpu.memory_space<vmem>>, vector<8x128xf32>
    tpu.vector_store %arg9[%c0_6, %c0_7], %7 {strides = array<i32>} : memref<8x128xf32, #tpu.memory_space<vmem>>, vector<8x128xf32>,
    %c0_8 = arith.constant 0 : index
    %c0_9 = arith.constant 0 : index
    %9 = vector.load %arg10[%c0_8, %c0_9] : memref<8x128xf32, #tpu.memory_space<vmem>>, vector<8x128xf32>
    %c0_10 = arith.constant 0 : index
    %c0_11 = arith.constant 0 : index
    %10 = vector.load %arg4[%c0_10, %c0_11] : memref<8x128xf32, #tpu.memory_space<vmem>>, vector<8x128xf32>
    %cst_12 = arith.constant dense<0.000000e+00> : vector<8x128xf32>
    %11 = tpu.matmul %10, %3, %cst_12 {dimension_numbers = #tpu.dot_dimension_numbers<[1], [0], [0], [1], [0, 0, 1, 1], [], []>} : vector<8x128xf32>, vector<128x128xf32>, vector<8x128xf32> -> vector<8x128xf32>
    %12 = arith.addf %9, %11 : vector<8x128xf32>
    %c0_13 = arith.constant 0 : index
    %c0_14 = arith.constant 0 : index
    %13 = vector.load %arg10[%c0_13, %c0_14] : memref<8x128xf32, #tpu.memory_space<vmem>>, vector<8x128xf32>
    tpu.vector_store %arg10[%c0_13, %c0_14], %12 {strides = array<i32>} : memref<8x128xf32, #tpu.memory_space<vmem>>, vector<8x128xf32>,
    %c0_i32_15 = arith.constant 0 : i32
    %14 = arith.cmpi eq, %arg2, %c0_i32_15 : i32
    %15 = arith.extui %14 : i1 to i32
    %c0_i32_16 = arith.constant 0 : i32
    %16 = arith.cmpi ne, %15, %c0_i32_16 : i32
    scf.if %16 {
      %c0_17 = arith.constant 0 : index
      %c0_18 = arith.constant 0 : index
      %17 = vector.load %arg6[%c0_17, %c0_18] : memref<1x128xf32, #tpu.memory_space<vmem>>, vector<1x128xf32>
      %c0_19 = arith.constant 0 : index
      %c0_20 = arith.constant 0 : index
      %18 = vector.load %arg9[%c0_19, %c0_20] : memref<8x128xf32, #tpu.memory_space<vmem>>, vector<8x128xf32>
      %19 = vector.broadcast %17 : vector<1x128xf32> to vector<8x128xf32>
      %20 = arith.addf %18, %19 : vector<8x128xf32>
      %c0_21 = arith.constant 0 : index
      %c0_22 = arith.constant 0 : index
      %21 = vector.load %arg7[%c0_21, %c0_22] : memref<8x128xf32, #tpu.memory_space<vmem>>, vector<8x128xf32>
      tpu.vector_store %arg7[%c0_21, %c0_22], %20 {strides = array<i32>} : memref<8x128xf32, #tpu.memory_space<vmem>>, vector<8x128xf32>,
      %c0_23 = arith.constant 0 : index
      %c0_24 = arith.constant 0 : index
      %22 = vector.load %arg10[%c0_23, %c0_24] : memref<8x128xf32, #tpu.memory_space<vmem>>, vector<8x128xf32>
      %23 = vector.broadcast %17 : vector<1x128xf32> to vector<8x128xf32>
      %24 = arith.addf %22, %23 : vector<8x128xf32>
      %c0_25 = arith.constant 0 : index
      %c0_26 = arith.constant 0 : index
      %25 = vector.load %arg8[%c0_25, %c0_26] : memref<8x128xf32, #tpu.memory_space<vmem>>, vector<8x128xf32>
      tpu.vector_store %arg8[%c0_25, %c0_26], %24 {strides = array<i32>} : memref<8x128xf32, #tpu.memory_space<vmem>>, vector<8x128xf32>,
    } else {
    }
    return
  }
  func.func @transform_0(%arg0: i32, %arg1: i32, %arg2: i32) -> (i32, i32) {
    %c0_i32 = arith.constant 0 : i32
    return %arg0, %arg2 : i32, i32
  }
  func.func @transform_1(%arg0: i32, %arg1: i32, %arg2: i32) -> (i32, i32) {
    %c0_i32 = arith.constant 0 : i32
    return %arg0, %arg2 : i32, i32
  }
  func.func @transform_2(%arg0: i32, %arg1: i32, %arg2: i32) -> (i32, i32) {
    %c0_i32 = arith.constant 0 : i32
    return %arg2, %arg1 : i32, i32
  }
  func.func @transform_3(%arg0: i32, %arg1: i32, %arg2: i32) -> (i32, i32) {
    %c0_i32 = arith.constant 0 : i32
    %c0_i32_0 = arith.constant 0 : i32
    return %c0_i32, %arg1 : i32, i32
  }
  func.func @transform_4(%arg0: i32, %arg1: i32, %arg2: i32) -> (i32, i32) {
    %c0_i32 = arith.constant 0 : i32
    return %arg0, %arg1 : i32, i32
  }
  func.func @transform_5(%arg0: i32, %arg1: i32, %arg2: i32) -> (i32, i32) {
    %c0_i32 = arith.constant 0 : i32
    return %arg0, %arg1 : i32, i32
  }
}

</mosaic_0001>

<bundles_post_ra>
// kernel: tpu_custom_call.1
= control target key start
LH: loop header
LB: loop body
LE: loop exit
PB: predicated region body
PF: predicated region fallthrough
CT: control target
= control target key end

     0   :  { %11 = vsyncpa [#allocation5], 0  ;;  %s658_s0 = inlined_call_operand.hbm [shape: f32[8,128], index: 0, kind: input, shape index: {}]   ;;  %s659_s1 = inlined_call_operand.hbm [shape: f32[8,128], index: 1, kind: input, shape index: {}]   ;;  %s660_s2 = inlined_call_operand.hbm [shape: f32[128,128], index: 2, kind: input, shape index: {}]   ;;  %s661_s3 = inlined_call_operand.vmem [shape: f32[1,128], index: 3, kind: input, shape index: {}]   ;;  %s662_s4 = inlined_call_operand.hbm [shape: f32[8,128], index: 4, kind: output, shape index: {0}]   ;;  %s663_s5 = inlined_call_operand.hbm [shape: f32[8,128], index: 5, kind: output, shape index: {1}]  }
   0x1   :  { %12 = vsyncpa [#allocation8], 0 }
   0x2   :  { %13 = vsyncpa [#allocation6], 0 }
   0x3   :  { %14 = vsyncpa [#allocation12], 0  ;;  %s555_s18 = smov [#allocation7]   ;;  %s556_s20 = smov [#allocation4]  }
   0x4   :  { %s31_s19 = sshll.u32 %s555_s18, 4  ;;  %s21_s21 = sshll.u32 %s556_s20, 4  ;;  %s32_s19 = int_to_ptr.vmem [resolvable:$true] %s31_s19  ;;  %s22_s21 = int_to_ptr.vmem [resolvable:$true] %s21_s21 }
   0x5   :  { %s437_s24 = scalar_lea.hbm %s659_s1, 128 }
   0x6   :  { %p438_p0 = scmp.ne.s32.totalorder %s659_s1, %s437_s24  ;;  %p441_p1 = scmp.lt.u32.totalorder %s437_s24, %s659_s1 }
   0x8   :  { %p443_p2 = pnand %p441_p1, %p438_p0 }
   0xa   :  { %446 = shalt.err (!%p443_p2)
}
   0xb   :  { %s447_s29 = scalar_lea.vmem %s32_s19, 128  ;;  %p452_p4 = scmp.lt.s32.totalorder %s32_s19, %s32_s19 }
   0xc   :  { %p448_p3 = scmp.ne.s32.totalorder %s32_s19, %s447_s29  ;;  %p453_p5 = scmp.lt.s32.totalorder %s447_s29, %s447_s29 }
   0xe   :  { %p454_p6 = por %p453_p5, %p452_p4 }
  0x10   :  { %p455_p7 = pnand %p454_p6, %p448_p3 }
  0x12   :  { %458 = shalt.err (!%p455_p7)
}
  0x13   :  { %34 = dma.hbm_to_vmem [thread:$0]  %s659_s1, 128, %s32_s19, [#allocation8]  }
  0x14   :  { %s459_s9 = scalar_lea.hbm %s658_s0, 128 }
  0x15   :  { %p460_p8 = scmp.ne.s32.totalorder %s658_s0, %s459_s9  ;;  %p463_p9 = scmp.lt.u32.totalorder %s459_s9, %s658_s0 }
  0x17   :  { %p465_p10 = pnand %p463_p9, %p460_p8 }
  0x19   :  { %468 = shalt.err (!%p465_p10)
}
  0x1a   :  { %s469_s14 = scalar_lea.vmem %s22_s21, 128  ;;  %p474_p12 = scmp.lt.s32.totalorder %s22_s21, %s22_s21 }
  0x1b   :  { %p470_p11 = scmp.ne.s32.totalorder %s22_s21, %s469_s14  ;;  %p475_p13 = scmp.lt.s32.totalorder %s469_s14, %s469_s14 }
  0x1d   :  { %p476_p0 = por %p475_p13, %p474_p12 }
  0x1f   :  { %p477_p1 = pnand %p476_p0, %p470_p11 }
  0x21   :  { %480 = shalt.err (!%p477_p1)
}
  0x22   :  { %24 = dma.hbm_to_vmem [thread:$0]  %s658_s0, 128, %s22_s21, [#allocation5]  }
  0x23   :  { %s557_s16 = smov [#allocation9]   ;;  %s481_s20 = scalar_lea.hbm %s660_s2, 2048 }
  0x24   :  { %s40_s17 = sshll.u32 %s557_s16, 4  ;;  %p482_p2 = scmp.ne.s32.totalorder %s660_s2, %s481_s20  ;;  %s41_s17 = int_to_ptr.vmem [resolvable:$true] %s40_s17 }
  0x25   :  { %p485_p3 = scmp.lt.u32.totalorder %s481_s20, %s660_s2 }
  0x27   :  { %p487_p4 = pnand %p485_p3, %p482_p2 }
  0x29   :  { %490 = shalt.err (!%p487_p4)
}
  0x2a   :  { %s491_s26 = scalar_lea.vmem %s41_s17, 2048  ;;  %p496_p6 = scmp.lt.s32.totalorder %s41_s17, %s41_s17 }
  0x2b   :  { %p492_p5 = scmp.ne.s32.totalorder %s41_s17, %s491_s26  ;;  %p497_p7 = scmp.lt.s32.totalorder %s491_s26, %s491_s26 }
  0x2d   :  { %p498_p8 = por %p497_p7, %p496_p6 }
  0x2f   :  { %p499_p9 = pnand %p498_p8, %p492_p5 }
  0x31   :  { %502 = shalt.err (!%p499_p9)
}
  0x32   :  { %s558_s0 = smov 128   ;;  %s559_s21 = smov 8  }
  0x33   :  { %46 = dma.hbm_to_vmem [thread:$0]  %s660_s2, 2048, %s41_s17, [#allocation8], %s558_s0, %s558_s0, %s559_s21  }
  0x34   :  { %547 = dma.done.wait [#allocation5], 128  }
  0x35   :  { %548 = vsyncadd [#allocation5], 4294967168 }
  0x36   :  { %549 = dma.done.wait [#allocation8], 2176  }
  0x37   :  { %550 = vsyncadd [#allocation8], 4294965120  ;;  %v560_v0 = vmov 0.0|0.0   ;;  %vm561_vm0 = vmmov 0   ;;  %v562_v1 = vmov 0.0   ;;  %v64_v2 = vld [vmem:[#allocation9] sm:$0xff] }
  0x38   :  { %379 = vmatprep.subr.bf16.mxu0 %v560_v0  ;;  %403 = vmatprep.subr.bf16.mxu1 %v560_v0  ;;  %v65_v3 = vld [vmem:[#allocation9 + $0x8] sm:$0xff]  ;;  %v66_v4 = vld [vmem:[#allocation9 + $0x10] sm:$0xff]  ;;  %v67_v6 = vld [vmem:[#allocation9 + $0x18] sm:$0xff]  ;;  %s563_s30 = smov [#allocation10]   ;;  %s564_s7 = smov [#allocation11]  }
  0x39   :  { %341 = vmatprep.mubr.msk.f32.mxu0 %vm561_vm0, %v562_v1  ;;  %376 = vmatprep.mubr.msk.f32.mxu1 %vm561_vm0, %v562_v1  ;;  %v380_v5 = vpack.c.bf16 %v65_v3, %v64_v2  ;;  %v383_v7 = vpack.c.bf16 %v67_v6, %v66_v4  ;;  %v68_v8 = vld [vmem:[#allocation9 + $0x20] sm:$0xff]  ;;  %v69_v9 = vld [vmem:[#allocation9 + $0x28] sm:$0xff]  ;;  %v70_v11 = vld [vmem:[#allocation9 + $0x30] sm:$0xff]  ;;  %s250_s6 = sshll.u32 %s563_s30, 4  ;;  %s260_s8 = sshll.u32 %s564_s7, 4  ;;  %s251_s6 = int_to_ptr.vmem [resolvable:$true] %s250_s6  ;;  %s261_s8 = int_to_ptr.vmem [resolvable:$true] %s260_s8 }
  0x3a   :  { %v386_v10 = vpack.c.bf16 %v69_v9, %v68_v8  ;;  %v71_v12 = vld [vmem:[#allocation9 + $0x38] sm:$0xff]  ;;  %v72_v14 = vld [vmem:[#allocation9 + $0x40] sm:$0xff]  ;;  %v73_v15 = vld [vmem:[#allocation9 + $0x48] sm:$0xff]  ;;  %s503_s9 = scalar_lea.vmem %s251_s6, 128  ;;  %p508_p11 = scmp.lt.s32.totalorder %s251_s6, %s251_s6 }
  0x3b   :  { %381 = vmatpush3.bf16.msra.mxu0 %v380_v5  ;;  %405 = vmatpush3.bf16.msra.mxu1 %v380_v5  ;;  %v389_v13 = vpack.c.bf16 %v71_v12, %v70_v11  ;;  %v392_v16 = vpack.c.bf16 %v73_v15, %v72_v14  ;;  %v74_v17 = vld [vmem:[#allocation9 + $0x50] sm:$0xff]  ;;  %v75_v18 = vld [vmem:[#allocation9 + $0x58] sm:$0xff]  ;;  %v76_v20 = vld [vmem:[#allocation9 + $0x60] sm:$0xff]  ;;  %p504_p10 = scmp.ne.s32.totalorder %s251_s6, %s503_s9  ;;  %p509_p12 = scmp.lt.s32.totalorder %s503_s9, %s503_s9 }
  0x3c   :  { %382 = vmatprep.subr.bf16.mxu0 %v560_v0  ;;  %406 = vmatprep.subr.bf16.mxu1 %v560_v0  ;;  %v395_v19 = vpack.c.bf16 %v75_v18, %v74_v17  ;;  %v77_v21 = vld [vmem:[#allocation9 + $0x68] sm:$0xff]  ;;  %v78_v23 = vld [vmem:[#allocation9 + $0x70] sm:$0xff]  ;;  %v79_v24 = vld [vmem:[#allocation9 + $0x78] sm:$0xff] }
  0x3d   :  { %v398_v22 = vpack.c.bf16 %v77_v21, %v76_v20  ;;  %v401_v25 = vpack.c.bf16 %v79_v24, %v78_v23  ;;  %v81_v26 = vld [vmem:[#allocation4] sm:$0xff]  ;;  %v155_v27 = vld [vmem:[#allocation7] sm:$0xff]  ;;  %p510_p13 = por %p509_p12, %p508_p11 }
  0x3e   :  { %v274_v28 = vld [vmem:[%s661_s3] ss:$0 sm:$0xff] }
  0x3f   :  { %384 = vmatpush3.bf16.msra.mxu0 %v383_v7  ;;  %408 = vmatpush3.bf16.msra.mxu1 %v383_v7  ;;  %p511_p0 = pnand %p510_p13, %p504_p10 }
  0x40   :  { %385 = vmatprep.subr.bf16.mxu0 %v560_v0  ;;  %409 = vmatprep.subr.bf16.mxu1 %v560_v0 }
  0x43   :  { %387 = vmatpush3.bf16.msra.mxu0 %v386_v10  ;;  %411 = vmatpush3.bf16.msra.mxu1 %v386_v10 }
  0x44   :  { %388 = vmatprep.subr.bf16.mxu0 %v560_v0  ;;  %412 = vmatprep.subr.bf16.mxu1 %v560_v0 }
  0x47   :  { %390 = vmatpush3.bf16.msra.mxu0 %v389_v13  ;;  %414 = vmatpush3.bf16.msra.mxu1 %v389_v13 }
  0x48   :  { %391 = vmatprep.subr.bf16.mxu0 %v560_v0  ;;  %415 = vmatprep.subr.bf16.mxu1 %v560_v0 }
  0x4b   :  { %393 = vmatpush3.bf16.msra.mxu0 %v392_v16  ;;  %417 = vmatpush3.bf16.msra.mxu1 %v392_v16 }
  0x4c   :  { %394 = vmatprep.subr.bf16.mxu0 %v560_v0  ;;  %418 = vmatprep.subr.bf16.mxu1 %v560_v0 }
  0x4f   :  { %396 = vmatpush3.bf16.msra.mxu0 %v395_v19  ;;  %420 = vmatpush3.bf16.msra.mxu1 %v395_v19 }
  0x50   :  { %397 = vmatprep.subr.bf16.mxu0 %v560_v0  ;;  %421 = vmatprep.subr.bf16.mxu1 %v560_v0 }
  0x53   :  { %399 = vmatpush3.bf16.msra.mxu0 %v398_v22  ;;  %423 = vmatpush3.bf16.msra.mxu1 %v398_v22 }
  0x54   :  { %400 = vmatprep.subr.bf16.mxu0 %v560_v0  ;;  %424 = vmatprep.subr.bf16.mxu1 %v560_v0 }
  0x57   :  { %402 = vmatpush3.bf16.msra.mxu0 %v401_v25  ;;  %426 = vmatpush3.bf16.msra.mxu1 %v401_v25 }
  0x5a   :  { %342 = vmatmul.mubr.f32.vlgmr.msra.gmra.mrb[0].mxu0 %v81_v26  ;;  %377 = vmatmul.mubr.f32.vlgmr.msra.gmra.mrb[0].mxu1 %v155_v27 }
 0x12d   :  { %v148_v29 = vpop.f32.mrb[0].mxu0  ;;  %v222_v30 = vpop.f32.mrb[0].mxu1 }
 0x12e   :  { %v239_v31 = vadd.f32 %v274_v28, %v148_v29  ;;  %v242_v32 = vadd.f32 %v274_v28, %v222_v30  ;;  %v343_v33 = vpop.f32.mrb[1].mxu0  ;;  %v378_v34 = vpop.f32.mrb[1].mxu1 }
 0x130   :  { %240 = vst [vmem:[#allocation10] sm:$0xff] %v239_v31  ;;  %243 = vst [vmem:[#allocation11] sm:$0xff] %v242_v32 }
 0x131   :  { %514 = shalt.err (!%p511_p0)
}
 0x132   :  { %s515_s11 = scalar_lea.hbm %s662_s4, 128 }
 0x133   :  { %p516_p1 = scmp.ne.s32.totalorder %s662_s4, %s515_s11  ;;  %p519_p2 = scmp.lt.u32.totalorder %s515_s11, %s662_s4 }
 0x135   :  { %p521_p3 = pnand %p519_p2, %p516_p1 }
 0x137   :  { %524 = shalt.err (!%p521_p3)
}
 0x138   :  { %253 = dma.vmem_to_hbm [thread:$0]  %s251_s6, 128, %s662_s4, [#allocation6]  }
 0x139   :  { %s525_s17 = scalar_lea.vmem %s261_s8, 128  ;;  %p530_p5 = scmp.lt.s32.totalorder %s261_s8, %s261_s8 }
 0x13a   :  { %p526_p4 = scmp.ne.s32.totalorder %s261_s8, %s525_s17  ;;  %p531_p6 = scmp.lt.s32.totalorder %s525_s17, %s525_s17 }
 0x13c   :  { %p532_p7 = por %p531_p6, %p530_p5 }
 0x13e   :  { %p533_p8 = pnand %p532_p7, %p526_p4 }
 0x140   :  { %536 = shalt.err (!%p533_p8)
}
 0x141   :  { %s537_s20 = scalar_lea.hbm %s663_s5, 128 }
 0x142   :  { %p538_p9 = scmp.ne.s32.totalorder %s663_s5, %s537_s20  ;;  %p541_p10 = scmp.lt.u32.totalorder %s537_s20, %s663_s5 }
 0x144   :  { %p543_p11 = pnand %p541_p10, %p538_p9 }
 0x146   :  { %546 = shalt.err (!%p543_p11)
}
 0x147   :  { %263 = dma.vmem_to_hbm [thread:$0]  %s261_s8, 128, %s663_s5, [#allocation12]  }
 0x148   :  { %551 = dma.done.wait [#allocation6], 128  }
 0x149   :  { %552 = vsyncadd [#allocation6], 4294967168 }
 0x14a   :  { %553 = dma.done.wait [#allocation12], 128  }
 0x14b   :  { %554 = vsyncadd [#allocation12], 4294967168 }
 0x14c   :  { %270 = vsyncpa [#allocation5], 1 }
 0x14d   :  { %271 = vsyncpa [#allocation8], 1 }
 0x14e   :  { %272 = vsyncpa [#allocation6], 1 }
 0x14f   :  { %273 = vsyncpa [#allocation12], 1 }

</bundles_post_ra>
